<compile_context>
chip_gen: v6e
topology: v6e:2x2x1
jax: 0.10.0
libtpu: 0.0.40
codegen_flags: <defaults>
</compile_context>

<pallas_src>
import jax
import jax.numpy as jnp
from jax.experimental import pallas as pl
from jax.experimental.pallas import tpu as pltpu


_LANE = 128
_VMEM_BUDGET = 12 * 1024 * 1024   # target for the double-buffered working set
_VMEM_LIMIT = 32 * 1024 * 1024    # >= scoped default on every gen, <= physical on v7x


def _round_up(v, m):
    return (v + m - 1) // m * m


def _ib_scale_kernel(x_ref, z_ref, out_ref):
    # (tm, ts) * (tm, 1) broadcast multiply.
    x = x_ref[...]
    z = z_ref[...]  # f32 per-row scale
    if x.dtype == jnp.float32:
        out_ref[...] = x * z
    else:
        # bf16/fp8 path: multiply natively (v6e/v7x VPUs are bf16-native),
        # avoiding the unpack/mul/pack f32 round-trip on the big tensor.
        # TODO(synk): PyTorch would promote bf16*f32 to f32 output; we keep x.dtype.
        out_ref[...] = x * z.astype(x.dtype)


def information_bottleneck_forward(x, post_z_mu, post_z_logD, eps, kl_mult=1.0,
                                   *, donate_x=False):
    """x: (N, C, H, W); post_z_mu/post_z_logD: (dim,); eps: (N, dim) std-normal.

    Returns (out, kld) matching InformationBottleneck.forward (training,
    sampling, masking=False) and its self.kld attribute.

    Set donate_x=True (and donate x at the jit boundary) to alias the output
    onto x's HBM buffer; leave False if x is still needed afterwards.
    """
    N, C, H, W = x.shape
    S = H * W
    dim = post_z_mu.shape[0]
    assert dim == C, "InformationBottleneck expects dim == channels for NCHW input"
    assert eps.shape == (N, dim)

    mu = post_z_mu.astype(jnp.float32)
    logD = post_z_logD.astype(jnp.float32)

    # Reparameterized per-(batch, channel) scale -- tiny, done once in JAX.
    z = mu[None, :] + eps.astype(jnp.float32) * jnp.exp(0.5 * logD)[None, :]  # (N, dim)

    # Closed-form KL divergence (O(dim) reduction) -- plain JAX in the wrapper.
    kld = (jnp.sum(jnp.log(1.0 + mu ** 2 / (jnp.exp(logD) + 1e-8)))
           * (C / dim) * float(S) * 0.5 * float(kl_mult))

    # Flatten to a row-wise broadcast multiply: (R, S) * (R, 1), R = N*C.
    # Both reshapes are free metadata ops on contiguous NCHW data.
    R = N * C
    x2 = x.reshape(R, S)
    z2 = z.reshape(R, 1)

    itemsize = jnp.dtype(x.dtype).itemsize
    sublane = {4: 8, 2: 16, 1: 32}.get(itemsize, 8)

    # Per-grid-step VMEM (double-buffered):
    #   x in + out blocks : 4 * tm * ts * itemsize
    #   z blocks          : lane-padded to 128 lanes -> 2 * tm * 128 * 4
    z_row_bytes = 2 * _LANE * 4

    min_block_total = sublane * (4 * S * itemsize + z_row_bytes)
    if min_block_total > _VMEM_BUDGET:
        # Large feature map: tile the spatial axis in lane-dense chunks so the
        # minimum block never blows scoped VMEM (worst on v7x's 64 MiB/TC).
        tm = sublane
        budget_xo = _VMEM_BUDGET - sublane * z_row_bytes
        ts = max(_LANE, (budget_xo // (4 * sublane * itemsize)) // _LANE * _LANE)
        ts = min(ts, _round_up(S, _LANE))
    else:
        ts = S  # full-extent last dim: no 128-divisibility requirement, no padding
        tm = (_VMEM_BUDGET // (4 * S * itemsize + z_row_bytes)) // sublane * sublane
        tm = max(sublane, tm)
        # Keep >= ~8 row blocks when R allows: v7x shards the parallel axes
        # across 2 TensorCores, and the pipeline needs steps to overlap.
        tm = min(tm, max(sublane, _round_up(-(-R // 8), sublane)))
        tm = min(tm, _round_up(R, sublane))

    grid = (pl.cdiv(R, tm), pl.cdiv(S, ts))

    cost = pl.CostEstimate(
        flops=R * S,
        transcendentals=0,
        bytes_accessed=2 * R * S * itemsize + R * 4,  # true (unpadded) traffic
    )

    out2 = pl.pallas_call(
        _ib_scale_kernel,
        out_shape=jax.ShapeDtypeStruct((R, S), x.dtype),
        grid_spec=pltpu.PrefetchScalarGridSpec(
            num_scalar_prefetch=0,
            grid=grid,
            in_specs=[
                pl.BlockSpec((tm, ts), lambda i, j: (i, j)),  # x rows
                pl.BlockSpec((tm, 1), lambda i, j: (i, 0)),   # per-row scale
            ],
            out_specs=pl.BlockSpec((tm, ts), lambda i, j: (i, j)),
        ),
        compiler_params=pltpu.CompilerParams(
            dimension_semantics=("parallel", "parallel"),
            vmem_limit_bytes=_VMEM_LIMIT,
        ),
        cost_estimate=cost,
        input_output_aliases=({0: 0} if donate_x else {}),
    )(x2, z2)

    out = out2.reshape(N, C, H, W)
    return out, kld


if __name__ == "__main__":
    # Small shapes consistent with the module's forward (NCHW input, dim == C).
    N, C, H, W = 2, 4, 16, 16
    dim = C
    init_mag, init_var, kl_mult = 9.0, 0.01, 1.0

    key = jax.random.PRNGKey(0)
    k_x, k_mu, k_logd, k_eps = jax.random.split(key, 4)

    x = jax.random.normal(k_x, (N, C, H, W), dtype=jnp.float32)
    # __init__: post_z_mu ~ N(1, init_var), post_z_logD ~ N(-init_mag, init_var)
    post_z_mu = 1.0 + init_var * jax.random.normal(k_mu, (dim,), dtype=jnp.float32)
    post_z_logD = -init_mag + init_var * jax.random.normal(k_logd, (dim,), dtype=jnp.float32)
    # reparameterize() randomness (torch .normal_()) generated here deterministically.
    eps = jax.random.normal(k_eps, (N, dim), dtype=jnp.float32)

    out, kld = information_bottleneck_forward(x, post_z_mu, post_z_logD, eps, kl_mult)
    out = jax.block_until_ready(out)
    kld = jax.block_until_ready(kld)

    # Pure-JAX reference check.
    z_ref = post_z_mu[None, :] + eps * jnp.exp(0.5 * post_z_logD)[None, :]
    out_ref = x * z_ref[:, :, None, None]
    kld_ref = (jnp.sum(jnp.log(1.0 + post_z_mu ** 2 / (jnp.exp(post_z_logD) + 1e-8)))
               * (C / dim) * (H * W) * 0.5 * kl_mult)
    assert jnp.allclose(out, out_ref, atol=1e-5, rtol=1e-5)
    assert jnp.allclose(kld, kld_ref, atol=1e-4, rtol=1e-5)

    print("KERNEL_OK")
</pallas_src>

<mosaic_0001>
module attributes {stable_mosaic.version = 11 : i64} {
  func.func @_ib_scale_kernel(%arg0: i32, %arg1: i32, %arg2: memref<8x256xf32, #tpu.memory_space<vmem>>, %arg3: memref<8x1xf32, #tpu.memory_space<vmem>>, %arg4: memref<8x256xf32, #tpu.memory_space<vmem>>) attributes {dimension_semantics = [#tpu.dimension_semantics<parallel>, #tpu.dimension_semantics<parallel>], iteration_bounds = array<i64: 1, 1>, scalar_prefetch = 0 : i64, scratch_operands = 0 : i64, tpu.core_type = #tpu.core_type<tc>, window_params = [{transform_indices = @transform_0, window_bounds = array<i64: 8, 256>}, {transform_indices = @transform_1, window_bounds = array<i64: 8, 1>}, {transform_indices = @transform_2, window_bounds = array<i64: 8, 256>}]} {
    %c0 = arith.constant 0 : index
    %c0_0 = arith.constant 0 : index
    %0 = vector.load %arg2[%c0, %c0_0] : memref<8x256xf32, #tpu.memory_space<vmem>>, vector<8x256xf32>
    %c0_1 = arith.constant 0 : index
    %c0_2 = arith.constant 0 : index
    %1 = vector.load %arg3[%c0_1, %c0_2] : memref<8x1xf32, #tpu.memory_space<vmem>>, vector<8x1xf32>
    %2 = vector.broadcast %1 : vector<8x1xf32> to vector<8x256xf32>
    %3 = arith.mulf %0, %2 : vector<8x256xf32>
    %c0_3 = arith.constant 0 : index
    %c0_4 = arith.constant 0 : index
    %4 = vector.load %arg4[%c0_3, %c0_4] : memref<8x256xf32, #tpu.memory_space<vmem>>, vector<8x256xf32>
    tpu.vector_store %arg4[%c0_3, %c0_4], %3 {strides = array<i32>} : memref<8x256xf32, #tpu.memory_space<vmem>>, vector<8x256xf32>,
    return
  }
  func.func @transform_0(%arg0: i32, %arg1: i32) -> (i32, i32) {
    %c0_i32 = arith.constant 0 : i32
    return %arg0, %arg1 : i32, i32
  }
  func.func @transform_1(%arg0: i32, %arg1: i32) -> (i32, i32) {
    %c0_i32 = arith.constant 0 : i32
    %c0_i32_0 = arith.constant 0 : i32
    return %arg0, %c0_i32 : i32, i32
  }
  func.func @transform_2(%arg0: i32, %arg1: i32) -> (i32, i32) {
    %c0_i32 = arith.constant 0 : i32
    return %arg0, %arg1 : i32, i32
  }
}

</mosaic_0001>

<bundles_post_ra>
// kernel: tpu_custom_call.1
= control target key start
LH: loop header
LB: loop body
LE: loop exit
PB: predicated region body
PF: predicated region fallthrough
CT: control target
= control target key end

     0   :  { %7 = vsyncpa [#allocation3], 0  ;;  %s126_s0 = inlined_call_operand.hbm [shape: f32[8,256], index: 0, kind: input, shape index: {}]   ;;  %s127_s1 = inlined_call_operand.vmem [shape: f32[8,1], index: 1, kind: input, shape index: {}]   ;;  %s128_s2 = inlined_call_operand.hbm [shape: f32[8,256], index: 2, kind: output, shape index: {}]  }
   0x1   :  { %8 = vsyncpa [#allocation4], 0  ;;  %s99_s9 = smov [#allocation2]  }
   0x2   :  { %s15_s10 = sshll.u32 %s99_s9, 4  ;;  %s16_s10 = int_to_ptr.vmem [resolvable:$true] %s15_s10 }
   0x3   :  { %s63_s11 = scalar_lea.vmem %s16_s10, 256  ;;  %p68_p1 = scmp.lt.s32.totalorder %s16_s10, %s16_s10 }
   0x4   :  { %p64_p0 = scmp.ne.s32.totalorder %s16_s10, %s63_s11  ;;  %p69_p2 = scmp.lt.s32.totalorder %s63_s11, %s63_s11 }
   0x6   :  { %p70_p3 = por %p69_p2, %p68_p1 }
   0x8   :  { %p71_p4 = pnand %p70_p3, %p64_p0 }
   0xa   :  { %74 = shalt.err (!%p71_p4)
}
   0xb   :  { %18 = dma.hbm_to_vmem [thread:$0]  %s126_s0, 256, %s16_s10, [#allocation3]  }
   0xc   :  { %95 = dma.done.wait [#allocation3], 256  }
   0xd   :  { %96 = vsyncadd [#allocation3], 4294967040  ;;  %v100_v0 = vmov 0   ;;  %v26_v1 = vld [vmem:[%s127_s1] sm:$0xff]  ;;  %v25_v3 = vld [vmem:[#allocation2 + $0x8] sm:$0xff]  ;;  %s101_s16 = smov [#allocation5]  }
   0xe   :  { %54 = vset.pattern.permute.xlu0 %v100_v0  ;;  %v24_v2 = vld [vmem:[#allocation2] sm:$0xff]  ;;  %s42_s17 = sshll.u32 %s101_s16, 4  ;;  %s43_s17 = int_to_ptr.vmem [resolvable:$true] %s42_s17 }
   0xf   :  { %29 = vperm.xlu0 %54, %v26_v1   ;;  %s75_s0 = scalar_lea.vmem %s43_s17, 256  ;;  %p80_p6 = scmp.lt.s32.totalorder %s43_s17, %s43_s17 }
  0x10   :  { %p76_p5 = scmp.ne.s32.totalorder %s43_s17, %s75_s0  ;;  %p81_p7 = scmp.lt.s32.totalorder %s75_s0, %s75_s0 }
  0x12   :  { %p82_p8 = por %p81_p7, %p80_p6 }
  0x14   :  { %p83_p9 = pnand %p82_p8, %p76_p5 }
  0x8a   :  { %v30_v4 = vpop.permute.xlu0 %29 }
  0x8b   :  { %v32_v5 = vmul.f32 %v30_v4, %v24_v2  ;;  %v33_v6 = vmul.f32 %v30_v4, %v25_v3 }
  0x8d   :  { %34 = vst [vmem:[#allocation5] sm:$0xff] %v32_v5  ;;  %35 = vst [vmem:[#allocation5 + $0x8] sm:$0xff] %v33_v6 }
  0x8e   :  { %86 = shalt.err (!%p83_p9)
}
  0x8f   :  { %45 = dma.vmem_to_hbm [thread:$0]  %s43_s17, 256, %s128_s2, [#allocation4]  }
  0x90   :  { %97 = dma.done.wait [#allocation4], 256  }
  0x91   :  { %98 = vsyncadd [#allocation4], 4294967040 }
  0x92   :  { %49 = vsyncpa [#allocation3], 1 }
  0x93   :  { %50 = vsyncpa [#allocation4], 1 }

</bundles_post_ra>
